<compile_context>
chip_gen: v7x
topology: tpu7x:2x2x1
jax: 0.10.0
libtpu: 0.0.40
codegen_flags: <defaults>
</compile_context>

<pallas_src>
import functools

import jax
import jax.numpy as jnp
from jax.experimental import pallas as pl
from jax.experimental.pallas import tpu as pltpu

HIDDEN = 16
MLP_HIDDEN = 8


def _gru_mlp_kernel(x_ref,     # (T*Bp, D)    time-major rows, batch padded to Bp
                    gru_ref,   # (H+D+2, 3H)  rows: [whh | wih | bhh | bih], lanes: r|z|n
                    l1_ref,    # (H+1, M)     rows: [w1 | b1]
                    l2_ref,    # (M+1, O)     rows: [w2 | b2]
                    out_ref,   # (Bp, O)
                    *, T, Bp, D):
    H = HIDDEN
    M = MLP_HIDDEN
    G = 3 * H
    f32 = jnp.float32

    # --- Unpack parameters: static, once-only sublane slices (whh/wih 8-aligned). ---
    whh = gru_ref[0:H, :]                      # (H, 3H)
    wih = gru_ref[H:H + D, :]                  # (D, 3H)
    bhh = gru_ref[H + D:H + D + 1, :]          # (1, 3H)
    bih = gru_ref[H + D + 1:H + D + 2, :]      # (1, 3H)

    # --- Hoisted input projection: one packed matmul for all gates & all steps. ---
    x2d = x_ref[...]                                               # (T*Bp, D)
    gi = jnp.dot(x2d, wih, preferred_element_type=f32) + bih       # (T*Bp, 3H)

    # Pre-broadcast the recurrent bias once (broadcast_in_dim is not CSE'd, so
    # doing it inside the unrolled loop would re-emit it every step).
    bhh_b = jnp.broadcast_to(bhh, (Bp, G))

    # h_0 = 0 (PyTorch default when no initial hidden state is given).
    # h lives in vregs as the loop carry — no VMEM round-trip on the serial path.
    h = jnp.zeros((Bp, H), f32)

    # Fully unrolled static time loop (T small & static -> full LLO visibility).
    # TODO(synk): switch to lax.fori_loop(..., unroll=k) if T grows beyond a few dozen.
    for t in range(T):
        lo = t * Bp                                 # 8-sublane aligned (Bp == 8)
        gi_t = gi[lo:lo + Bp, :]                    # (Bp, 3H) aligned sublane slice
        # ONE recurrent matmul per step: (Bp, H) @ (H, 3H) — single MXU round trip.
        gh = jnp.dot(h, whh, preferred_element_type=f32) + bhh_b   # (Bp, 3H)
        # PyTorch GRU semantics: r, z, n ; n uses r * (Whn h + bhn).
        rz = jax.nn.sigmoid(gi_t[:, :2 * H] + gh[:, :2 * H])       # (Bp, 2H)
        r = rz[:, :H]
        z = rz[:, H:]
        n = jnp.tanh(gi_t[:, 2 * H:] + r * gh[:, 2 * H:])
        h = (1.0 - z) * n + z * h

    # --- MLP head on the last hidden state: X[:, -1, :] -> ReLU(Linear) -> Linear. ---
    w1 = l1_ref[0:H, :]
    b1 = l1_ref[H:H + 1, :]
    w2 = l2_ref[0:M, :]
    b2 = l2_ref[M:M + 1, :]
    y1 = jnp.maximum(jnp.dot(h, w1, preferred_element_type=f32) + b1, 0.0)
    y2 = jnp.dot(y1, w2, preferred_element_type=f32) + b2
    out_ref[...] = y2.astype(out_ref.dtype)


def rnn_module_forward(x_btd, params):
    """x_btd: (B, T, D) float32, batch_first like the PyTorch module."""
    B, T, D = x_btd.shape
    out_dim = params["w2"].shape[1]
    Bp = ((B + 7) // 8) * 8          # pad batch to an 8-sublane multiple

    # Layout plumbing only (sub-KB at these shapes): time-major, batch padded to Bp
    # so every per-step slice inside the kernel is 8-sublane aligned.
    x_tbd = jnp.transpose(x_btd, (1, 0, 2))                   # (T, B, D)
    x_tbd = jnp.pad(x_tbd, ((0, 0), (0, Bp - B), (0, 0)))     # (T, Bp, D)
    x2d = x_tbd.reshape(T * Bp, D)

    # Consolidated parameter operands (fewer, larger DMAs). Gate order r|z|n along lanes.
    cat = jnp.concatenate
    whh = cat([params["whh"][g] for g in range(3)], axis=1)   # (H, 3H)
    wih = cat([params["wih"][g] for g in range(3)], axis=1)   # (D, 3H)
    bhh = cat([params["bhh"][g] for g in range(3)], axis=1)   # (1, 3H)
    bih = cat([params["bih"][g] for g in range(3)], axis=1)   # (1, 3H)
    gru_p = cat([whh, wih, bhh, bih], axis=0)                 # (H+D+2, 3H)
    l1_p = cat([params["w1"], params["b1"]], axis=0)          # (H+1, M)
    l2_p = cat([params["w2"], params["b2"]], axis=0)          # (M+1, out)

    kernel = functools.partial(_gru_mlp_kernel, T=T, Bp=Bp, D=D)
    vmem = pltpu.MemorySpace.VMEM

    # No grid: single-shot kernel, all operands resident in VMEM (everything is tiny).
    # TODO(synk): for long sequences / big batches, stream gi over T via a grid axis
    # (size the T-block to ~half the v6e footprint on v7x's 64 MiB VMEM) and only
    # then add a 'parallel' batch axis for dual-TC chips.
    out = pl.pallas_call(
        kernel,
        out_shape=jax.ShapeDtypeStruct((Bp, out_dim), jnp.float32),
        in_specs=[pl.BlockSpec(memory_space=vmem)] * 4,
        out_specs=pl.BlockSpec(memory_space=vmem),
    )(x2d, gru_p, l1_p, l2_p)

    # Drop padded batch rows. (torch.squeeze(X[:, -1, :]) is a no-op for B > 1.)
    return out[:B]


def init_params(key, input_dim, output_dim):
    """Deterministic synthetic parameters matching PyTorch GRU/Linear shapes.

    Gate weights are stored split along a leading gate axis (order r|z|n) and
    pre-transposed to (in_features, out_features); the wrapper packs them.
    """
    ks = jax.random.split(key, 8)
    H, M = HIDDEN, MLP_HIDDEN
    s = 0.1
    return {
        # torch GRU weight_ih_l0 is (3H, D); here: (3, D, H), gate order r|z|n.
        "wih": s * jax.random.normal(ks[0], (3, input_dim, H), jnp.float32),
        "whh": s * jax.random.normal(ks[1], (3, H, H), jnp.float32),
        "bih": s * jax.random.normal(ks[2], (3, 1, H), jnp.float32),
        "bhh": s * jax.random.normal(ks[3], (3, 1, H), jnp.float32),
        # linear1: torch (8, 16) -> (16, 8)
        "w1": s * jax.random.normal(ks[4], (H, M), jnp.float32),
        "b1": s * jax.random.normal(ks[5], (1, M), jnp.float32),
        # linear2: torch (out, 8) -> (8, out)
        "w2": s * jax.random.normal(ks[6], (M, output_dim), jnp.float32),
        "b2": s * jax.random.normal(ks[7], (1, output_dim), jnp.float32),
    }


def _reference(x_btd, params):
    """Pure-JAX reference of the same forward pass (sanity check)."""
    B, T, D = x_btd.shape
    H = HIDDEN
    wih, whh, bih, bhh = params["wih"], params["whh"], params["bih"], params["bhh"]
    h = jnp.zeros((B, H), jnp.float32)
    for t in range(T):
        x_t = x_btd[:, t, :]
        r = jax.nn.sigmoid(x_t @ wih[0] + bih[0] + h @ whh[0] + bhh[0])
        z = jax.nn.sigmoid(x_t @ wih[1] + bih[1] + h @ whh[1] + bhh[1])
        n = jnp.tanh(x_t @ wih[2] + bih[2] + r * (h @ whh[2] + bhh[2]))
        h = (1.0 - z) * n + z * h
    y = jnp.maximum(h @ params["w1"] + params["b1"], 0.0)
    return y @ params["w2"] + params["b2"]


if __name__ == "__main__":
    key = jax.random.PRNGKey(0)
    k_x, k_p = jax.random.split(key)

    B, T, D, OUT = 2, 8, 4, 4
    x = jax.random.normal(k_x, (B, T, D), jnp.float32)
    params = init_params(k_p, D, OUT)

    out = rnn_module_forward(x, params)
    out = jax.block_until_ready(out)

    ref = _reference(x, params)
    assert out.shape == (B, OUT)
    assert jnp.allclose(out, ref, atol=1e-5, rtol=1e-5), "mismatch vs JAX reference"

    print("KERNEL_OK")
</pallas_src>

<mosaic_0001>
module attributes {stable_mosaic.version = 11 : i64} {
  func.func @_gru_mlp_kernel(%arg0: memref<64x4xf32, #tpu.memory_space<vmem>>, %arg1: memref<22x48xf32, #tpu.memory_space<vmem>>, %arg2: memref<17x8xf32, #tpu.memory_space<vmem>>, %arg3: memref<9x4xf32, #tpu.memory_space<vmem>>, %arg4: memref<8x4xf32, #tpu.memory_space<vmem>>) attributes {dimension_semantics = [], scalar_prefetch = 0 : i64, scratch_operands = 0 : i64, tpu.core_type = #tpu.core_type<tc>} {
    %c0 = arith.constant 0 : index
    %c0_0 = arith.constant 0 : index
    %0 = vector.load %arg1[%c0, %c0_0] : memref<22x48xf32, #tpu.memory_space<vmem>>, vector<16x48xf32>
    %c16 = arith.constant 16 : index
    %c0_1 = arith.constant 0 : index
    %1 = vector.load %arg1[%c16, %c0_1] : memref<22x48xf32, #tpu.memory_space<vmem>>, vector<4x48xf32>
    %c20 = arith.constant 20 : index
    %c0_2 = arith.constant 0 : index
    %2 = vector.load %arg1[%c20, %c0_2] : memref<22x48xf32, #tpu.memory_space<vmem>>, vector<1x48xf32>
    %c21 = arith.constant 21 : index
    %c0_3 = arith.constant 0 : index
    %3 = vector.load %arg1[%c21, %c0_3] : memref<22x48xf32, #tpu.memory_space<vmem>>, vector<1x48xf32>
    %c0_4 = arith.constant 0 : index
    %c0_5 = arith.constant 0 : index
    %4 = vector.load %arg0[%c0_4, %c0_5] : memref<64x4xf32, #tpu.memory_space<vmem>>, vector<64x4xf32>
    %cst = arith.constant dense<0.000000e+00> : vector<64x48xf32>
    %5 = tpu.matmul %4, %1, %cst {dimension_numbers = #tpu.dot_dimension_numbers<[1], [0], [0], [1], [0, 0, 1, 1], [], []>} : vector<64x4xf32>, vector<4x48xf32>, vector<64x48xf32> -> vector<64x48xf32>
    %6 = vector.broadcast %3 : vector<1x48xf32> to vector<64x48xf32>
    %7 = arith.addf %5, %6 : vector<64x48xf32>
    %8 = vector.shape_cast %2 : vector<1x48xf32> to vector<1x48xf32>
    %9 = vector.broadcast %8 : vector<1x48xf32> to vector<8x48xf32>
    %cst_6 = arith.constant 0.000000e+00 : f32
    %10 = vector.broadcast %cst_6 : f32 to vector<8x16xf32>
    %11 = vector.extract_strided_slice %7 {offsets = [0, 0], sizes = [8, 48], strides = [1, 1]} : vector<64x48xf32> to vector<8x48xf32>
    %cst_7 = arith.constant dense<0.000000e+00> : vector<8x48xf32>
    %12 = tpu.matmul %10, %0, %cst_7 {dimension_numbers = #tpu.dot_dimension_numbers<[1], [0], [0], [1], [0, 0, 1, 1], [], []>} : vector<8x16xf32>, vector<16x48xf32>, vector<8x48xf32> -> vector<8x48xf32>
    %13 = arith.addf %12, %9 : vector<8x48xf32>
    %14 = vector.extract_strided_slice %11 {offsets = [0, 0], sizes = [8, 32], strides = [1, 1]} : vector<8x48xf32> to vector<8x32xf32>
    %15 = vector.extract_strided_slice %13 {offsets = [0, 0], sizes = [8, 32], strides = [1, 1]} : vector<8x48xf32> to vector<8x32xf32>
    %16 = arith.addf %14, %15 : vector<8x32xf32>
    %17 = arith.negf %16 : vector<8x32xf32>
    %18 = math.exp %17 : vector<8x32xf32>
    %cst_8 = arith.constant 1.000000e+00 : f32
    %19 = vector.broadcast %cst_8 : f32 to vector<8x32xf32>
    %20 = arith.addf %19, %18 : vector<8x32xf32>
    %21 = arith.divf %19, %20 : vector<8x32xf32>
    %22 = vector.extract_strided_slice %21 {offsets = [0, 0], sizes = [8, 16], strides = [1, 1]} : vector<8x32xf32> to vector<8x16xf32>
    %23 = vector.extract_strided_slice %21 {offsets = [0, 16], sizes = [8, 16], strides = [1, 1]} : vector<8x32xf32> to vector<8x16xf32>
    %24 = vector.extract_strided_slice %11 {offsets = [0, 32], sizes = [8, 16], strides = [1, 1]} : vector<8x48xf32> to vector<8x16xf32>
    %25 = vector.extract_strided_slice %13 {offsets = [0, 32], sizes = [8, 16], strides = [1, 1]} : vector<8x48xf32> to vector<8x16xf32>
    %26 = arith.mulf %22, %25 : vector<8x16xf32>
    %27 = arith.addf %24, %26 : vector<8x16xf32>
    %28 = math.tanh %27 : vector<8x16xf32>
    %cst_9 = arith.constant 1.000000e+00 : f32
    %29 = vector.broadcast %cst_9 : f32 to vector<8x16xf32>
    %30 = arith.subf %29, %23 : vector<8x16xf32>
    %31 = arith.mulf %30, %28 : vector<8x16xf32>
    %32 = arith.mulf %23, %10 : vector<8x16xf32>
    %33 = arith.addf %31, %32 : vector<8x16xf32>
    %34 = vector.extract_strided_slice %7 {offsets = [8, 0], sizes = [8, 48], strides = [1, 1]} : vector<64x48xf32> to vector<8x48xf32>
    %cst_10 = arith.constant dense<0.000000e+00> : vector<8x48xf32>
    %35 = tpu.matmul %33, %0, %cst_10 {dimension_numbers = #tpu.dot_dimension_numbers<[1], [0], [0], [1], [0, 0, 1, 1], [], []>} : vector<8x16xf32>, vector<16x48xf32>, vector<8x48xf32> -> vector<8x48xf32>
    %36 = arith.addf %35, %9 : vector<8x48xf32>
    %37 = vector.extract_strided_slice %34 {offsets = [0, 0], sizes = [8, 32], strides = [1, 1]} : vector<8x48xf32> to vector<8x32xf32>
    %38 = vector.extract_strided_slice %36 {offsets = [0, 0], sizes = [8, 32], strides = [1, 1]} : vector<8x48xf32> to vector<8x32xf32>
    %39 = arith.addf %37, %38 : vector<8x32xf32>
    %40 = arith.negf %39 : vector<8x32xf32>
    %41 = math.exp %40 : vector<8x32xf32>
    %cst_11 = arith.constant 1.000000e+00 : f32
    %42 = vector.broadcast %cst_11 : f32 to vector<8x32xf32>
    %43 = arith.addf %42, %41 : vector<8x32xf32>
    %44 = arith.divf %42, %43 : vector<8x32xf32>
    %45 = vector.extract_strided_slice %44 {offsets = [0, 0], sizes = [8, 16], strides = [1, 1]} : vector<8x32xf32> to vector<8x16xf32>
    %46 = vector.extract_strided_slice %44 {offsets = [0, 16], sizes = [8, 16], strides = [1, 1]} : vector<8x32xf32> to vector<8x16xf32>
    %47 = vector.extract_strided_slice %34 {offsets = [0, 32], sizes = [8, 16], strides = [1, 1]} : vector<8x48xf32> to vector<8x16xf32>
    %48 = vector.extract_strided_slice %36 {offsets = [0, 32], sizes = [8, 16], strides = [1, 1]} : vector<8x48xf32> to vector<8x16xf32>
    %49 = arith.mulf %45, %48 : vector<8x16xf32>
    %50 = arith.addf %47, %49 : vector<8x16xf32>
    %51 = math.tanh %50 : vector<8x16xf32>
    %cst_12 = arith.constant 1.000000e+00 : f32
    %52 = vector.broadcast %cst_12 : f32 to vector<8x16xf32>
    %53 = arith.subf %52, %46 : vector<8x16xf32>
    %54 = arith.mulf %53, %51 : vector<8x16xf32>
    %55 = arith.mulf %46, %33 : vector<8x16xf32>
    %56 = arith.addf %54, %55 : vector<8x16xf32>
    %57 = vector.extract_strided_slice %7 {offsets = [16, 0], sizes = [8, 48], strides = [1, 1]} : vector<64x48xf32> to vector<8x48xf32>
    %cst_13 = arith.constant dense<0.000000e+00> : vector<8x48xf32>
    %58 = tpu.matmul %56, %0, %cst_13 {dimension_numbers = #tpu.dot_dimension_numbers<[1], [0], [0], [1], [0, 0, 1, 1], [], []>} : vector<8x16xf32>, vector<16x48xf32>, vector<8x48xf32> -> vector<8x48xf32>
    %59 = arith.addf %58, %9 : vector<8x48xf32>
    %60 = vector.extract_strided_slice %57 {offsets = [0, 0], sizes = [8, 32], strides = [1, 1]} : vector<8x48xf32> to vector<8x32xf32>
    %61 = vector.extract_strided_slice %59 {offsets = [0, 0], sizes = [8, 32], strides = [1, 1]} : vector<8x48xf32> to vector<8x32xf32>
    %62 = arith.addf %60, %61 : vector<8x32xf32>
    %63 = arith.negf %62 : vector<8x32xf32>
    %64 = math.exp %63 : vector<8x32xf32>
    %cst_14 = arith.constant 1.000000e+00 : f32
    %65 = vector.broadcast %cst_14 : f32 to vector<8x32xf32>
    %66 = arith.addf %65, %64 : vector<8x32xf32>
    %67 = arith.divf %65, %66 : vector<8x32xf32>
    %68 = vector.extract_strided_slice %67 {offsets = [0, 0], sizes = [8, 16], strides = [1, 1]} : vector<8x32xf32> to vector<8x16xf32>
    %69 = vector.extract_strided_slice %67 {offsets = [0, 16], sizes = [8, 16], strides = [1, 1]} : vector<8x32xf32> to vector<8x16xf32>
    %70 = vector.extract_strided_slice %57 {offsets = [0, 32], sizes = [8, 16], strides = [1, 1]} : vector<8x48xf32> to vector<8x16xf32>
    %71 = vector.extract_strided_slice %59 {offsets = [0, 32], sizes = [8, 16], strides = [1, 1]} : vector<8x48xf32> to vector<8x16xf32>
    %72 = arith.mulf %68, %71 : vector<8x16xf32>
    %73 = arith.addf %70, %72 : vector<8x16xf32>
    %74 = math.tanh %73 : vector<8x16xf32>
    %cst_15 = arith.constant 1.000000e+00 : f32
    %75 = vector.broadcast %cst_15 : f32 to vector<8x16xf32>
    %76 = arith.subf %75, %69 : vector<8x16xf32>
    %77 = arith.mulf %76, %74 : vector<8x16xf32>
    %78 = arith.mulf %69, %56 : vector<8x16xf32>
    %79 = arith.addf %77, %78 : vector<8x16xf32>
    %80 = vector.extract_strided_slice %7 {offsets = [24, 0], sizes = [8, 48], strides = [1, 1]} : vector<64x48xf32> to vector<8x48xf32>
    %cst_16 = arith.constant dense<0.000000e+00> : vector<8x48xf32>
    %81 = tpu.matmul %79, %0, %cst_16 {dimension_numbers = #tpu.dot_dimension_numbers<[1], [0], [0], [1], [0, 0, 1, 1], [], []>} : vector<8x16xf32>, vector<16x48xf32>, vector<8x48xf32> -> vector<8x48xf32>
    %82 = arith.addf %81, %9 : vector<8x48xf32>
    %83 = vector.extract_strided_slice %80 {offsets = [0, 0], sizes = [8, 32], strides = [1, 1]} : vector<8x48xf32> to vector<8x32xf32>
    %84 = vector.extract_strided_slice %82 {offsets = [0, 0], sizes = [8, 32], strides = [1, 1]} : vector<8x48xf32> to vector<8x32xf32>
    %85 = arith.addf %83, %84 : vector<8x32xf32>
    %86 = arith.negf %85 : vector<8x32xf32>
    %87 = math.exp %86 : vector<8x32xf32>
    %cst_17 = arith.constant 1.000000e+00 : f32
    %88 = vector.broadcast %cst_17 : f32 to vector<8x32xf32>
    %89 = arith.addf %88, %87 : vector<8x32xf32>
    %90 = arith.divf %88, %89 : vector<8x32xf32>
    %91 = vector.extract_strided_slice %90 {offsets = [0, 0], sizes = [8, 16], strides = [1, 1]} : vector<8x32xf32> to vector<8x16xf32>
    %92 = vector.extract_strided_slice %90 {offsets = [0, 16], sizes = [8, 16], strides = [1, 1]} : vector<8x32xf32> to vector<8x16xf32>
    %93 = vector.extract_strided_slice %80 {offsets = [0, 32], sizes = [8, 16], strides = [1, 1]} : vector<8x48xf32> to vector<8x16xf32>
    %94 = vector.extract_strided_slice %82 {offsets = [0, 32], sizes = [8, 16], strides = [1, 1]} : vector<8x48xf32> to vector<8x16xf32>
    %95 = arith.mulf %91, %94 : vector<8x16xf32>
    %96 = arith.addf %93, %95 : vector<8x16xf32>
    %97 = math.tanh %96 : vector<8x16xf32>
    %cst_18 = arith.constant 1.000000e+00 : f32
    %98 = vector.broadcast %cst_18 : f32 to vector<8x16xf32>
    %99 = arith.subf %98, %92 : vector<8x16xf32>
    %100 = arith.mulf %99, %97 : vector<8x16xf32>
    %101 = arith.mulf %92, %79 : vector<8x16xf32>
    %102 = arith.addf %100, %101 : vector<8x16xf32>
    %103 = vector.extract_strided_slice %7 {offsets = [32, 0], sizes = [8, 48], strides = [1, 1]} : vector<64x48xf32> to vector<8x48xf32>
    %cst_19 = arith.constant dense<0.000000e+00> : vector<8x48xf32>
    %104 = tpu.matmul %102, %0, %cst_19 {dimension_numbers = #tpu.dot_dimension_numbers<[1], [0], [0], [1], [0, 0, 1, 1], [], []>} : vector<8x16xf32>, vector<16x48xf32>, vector<8x48xf32> -> vector<8x48xf32>
    %105 = arith.addf %104, %9 : vector<8x48xf32>
    %106 = vector.extract_strided_slice %103 {offsets = [0, 0], sizes = [8, 32], strides = [1, 1]} : vector<8x48xf32> to vector<8x32xf32>
    %107 = vector.extract_strided_slice %105 {offsets = [0, 0], sizes = [8, 32], strides = [1, 1]} : vector<8x48xf32> to vector<8x32xf32>
    %108 = arith.addf %106, %107 : vector<8x32xf32>
    %109 = arith.negf %108 : vector<8x32xf32>
    %110 = math.exp %109 : vector<8x32xf32>
    %cst_20 = arith.constant 1.000000e+00 : f32
    %111 = vector.broadcast %cst_20 : f32 to vector<8x32xf32>
    %112 = arith.addf %111, %110 : vector<8x32xf32>
    %113 = arith.divf %111, %112 : vector<8x32xf32>
    %114 = vector.extract_strided_slice %113 {offsets = [0, 0], sizes = [8, 16], strides = [1, 1]} : vector<8x32xf32> to vector<8x16xf32>
    %115 = vector.extract_strided_slice %113 {offsets = [0, 16], sizes = [8, 16], strides = [1, 1]} : vector<8x32xf32> to vector<8x16xf32>
    %116 = vector.extract_strided_slice %103 {offsets = [0, 32], sizes = [8, 16], strides = [1, 1]} : vector<8x48xf32> to vector<8x16xf32>
    %117 = vector.extract_strided_slice %105 {offsets = [0, 32], sizes = [8, 16], strides = [1, 1]} : vector<8x48xf32> to vector<8x16xf32>
    %118 = arith.mulf %114, %117 : vector<8x16xf32>
    %119 = arith.addf %116, %118 : vector<8x16xf32>
    %120 = math.tanh %119 : vector<8x16xf32>
    %cst_21 = arith.constant 1.000000e+00 : f32
    %121 = vector.broadcast %cst_21 : f32 to vector<8x16xf32>
    %122 = arith.subf %121, %115 : vector<8x16xf32>
    %123 = arith.mulf %122, %120 : vector<8x16xf32>
    %124 = arith.mulf %115, %102 : vector<8x16xf32>
    %125 = arith.addf %123, %124 : vector<8x16xf32>
    %126 = vector.extract_strided_slice %7 {offsets = [40, 0], sizes = [8, 48], strides = [1, 1]} : vector<64x48xf32> to vector<8x48xf32>
    %cst_22 = arith.constant dense<0.000000e+00> : vector<8x48xf32>
    %127 = tpu.matmul %125, %0, %cst_22 {dimension_numbers = #tpu.dot_dimension_numbers<[1], [0], [0], [1], [0, 0, 1, 1], [], []>} : vector<8x16xf32>, vector<16x48xf32>, vector<8x48xf32> -> vector<8x48xf32>
    %128 = arith.addf %127, %9 : vector<8x48xf32>
    %129 = vector.extract_strided_slice %126 {offsets = [0, 0], sizes = [8, 32], strides = [1, 1]} : vector<8x48xf32> to vector<8x32xf32>
    %130 = vector.extract_strided_slice %128 {offsets = [0, 0], sizes = [8, 32], strides = [1, 1]} : vector<8x48xf32> to vector<8x32xf32>
    %131 = arith.addf %129, %130 : vector<8x32xf32>
    %132 = arith.negf %131 : vector<8x32xf32>
    %133 = math.exp %132 : vector<8x32xf32>
    %cst_23 = arith.constant 1.000000e+00 : f32
    %134 = vector.broadcast %cst_23 : f32 to vector<8x32xf32>
    %135 = arith.addf %134, %133 : vector<8x32xf32>
    %136 = arith.divf %134, %135 : vector<8x32xf32>
    %137 = vector.extract_strided_slice %136 {offsets = [0, 0], sizes = [8, 16], strides = [1, 1]} : vector<8x32xf32> to vector<8x16xf32>
    %138 = vector.extract_strided_slice %136 {offsets = [0, 16], sizes = [8, 16], strides = [1, 1]} : vector<8x32xf32> to vector<8x16xf32>
    %139 = vector.extract_strided_slice %126 {offsets = [0, 32], sizes = [8, 16], strides = [1, 1]} : vector<8x48xf32> to vector<8x16xf32>
    %140 = vector.extract_strided_slice %128 {offsets = [0, 32], sizes = [8, 16], strides = [1, 1]} : vector<8x48xf32> to vector<8x16xf32>
    %141 = arith.mulf %137, %140 : vector<8x16xf32>
    %142 = arith.addf %139, %141 : vector<8x16xf32>
    %143 = math.tanh %142 : vector<8x16xf32>
    %cst_24 = arith.constant 1.000000e+00 : f32
    %144 = vector.broadcast %cst_24 : f32 to vector<8x16xf32>
    %145 = arith.subf %144, %138 : vector<8x16xf32>
    %146 = arith.mulf %145, %143 : vector<8x16xf32>
    %147 = arith.mulf %138, %125 : vector<8x16xf32>
    %148 = arith.addf %146, %147 : vector<8x16xf32>
    %149 = vector.extract_strided_slice %7 {offsets = [48, 0], sizes = [8, 48], strides = [1, 1]} : vector<64x48xf32> to vector<8x48xf32>
    %cst_25 = arith.constant dense<0.000000e+00> : vector<8x48xf32>
    %150 = tpu.matmul %148, %0, %cst_25 {dimension_numbers = #tpu.dot_dimension_numbers<[1], [0], [0], [1], [0, 0, 1, 1], [], []>} : vector<8x16xf32>, vector<16x48xf32>, vector<8x48xf32> -> vector<8x48xf32>
    %151 = arith.addf %150, %9 : vector<8x48xf32>
    %152 = vector.extract_strided_slice %149 {offsets = [0, 0], sizes = [8, 32], strides = [1, 1]} : vector<8x48xf32> to vector<8x32xf32>
    %153 = vector.extract_strided_slice %151 {offsets = [0, 0], sizes = [8, 32], strides = [1, 1]} : vector<8x48xf32> to vector<8x32xf32>
    %154 = arith.addf %152, %153 : vector<8x32xf32>
    %155 = arith.negf %154 : vector<8x32xf32>
    %156 = math.exp %155 : vector<8x32xf32>
    %cst_26 = arith.constant 1.000000e+00 : f32
    %157 = vector.broadcast %cst_26 : f32 to vector<8x32xf32>
    %158 = arith.addf %157, %156 : vector<8x32xf32>
    %159 = arith.divf %157, %158 : vector<8x32xf32>
    %160 = vector.extract_strided_slice %159 {offsets = [0, 0], sizes = [8, 16], strides = [1, 1]} : vector<8x32xf32> to vector<8x16xf32>
    %161 = vector.extract_strided_slice %159 {offsets = [0, 16], sizes = [8, 16], strides = [1, 1]} : vector<8x32xf32> to vector<8x16xf32>
    %162 = vector.extract_strided_slice %149 {offsets = [0, 32], sizes = [8, 16], strides = [1, 1]} : vector<8x48xf32> to vector<8x16xf32>
    %163 = vector.extract_strided_slice %151 {offsets = [0, 32], sizes = [8, 16], strides = [1, 1]} : vector<8x48xf32> to vector<8x16xf32>
    %164 = arith.mulf %160, %163 : vector<8x16xf32>
    %165 = arith.addf %162, %164 : vector<8x16xf32>
    %166 = math.tanh %165 : vector<8x16xf32>
    %cst_27 = arith.constant 1.000000e+00 : f32
    %167 = vector.broadcast %cst_27 : f32 to vector<8x16xf32>
    %168 = arith.subf %167, %161 : vector<8x16xf32>
    %169 = arith.mulf %168, %166 : vector<8x16xf32>
    %170 = arith.mulf %161, %148 : vector<8x16xf32>
    %171 = arith.addf %169, %170 : vector<8x16xf32>
    %172 = vector.extract_strided_slice %7 {offsets = [56, 0], sizes = [8, 48], strides = [1, 1]} : vector<64x48xf32> to vector<8x48xf32>
    %cst_28 = arith.constant dense<0.000000e+00> : vector<8x48xf32>
    %173 = tpu.matmul %171, %0, %cst_28 {dimension_numbers = #tpu.dot_dimension_numbers<[1], [0], [0], [1], [0, 0, 1, 1], [], []>} : vector<8x16xf32>, vector<16x48xf32>, vector<8x48xf32> -> vector<8x48xf32>
    %174 = arith.addf %173, %9 : vector<8x48xf32>
    %175 = vector.extract_strided_slice %172 {offsets = [0, 0], sizes = [8, 32], strides = [1, 1]} : vector<8x48xf32> to vector<8x32xf32>
    %176 = vector.extract_strided_slice %174 {offsets = [0, 0], sizes = [8, 32], strides = [1, 1]} : vector<8x48xf32> to vector<8x32xf32>
    %177 = arith.addf %175, %176 : vector<8x32xf32>
    %178 = arith.negf %177 : vector<8x32xf32>
    %179 = math.exp %178 : vector<8x32xf32>
    %cst_29 = arith.constant 1.000000e+00 : f32
    %180 = vector.broadcast %cst_29 : f32 to vector<8x32xf32>
    %181 = arith.addf %180, %179 : vector<8x32xf32>
    %182 = arith.divf %180, %181 : vector<8x32xf32>
    %183 = vector.extract_strided_slice %182 {offsets = [0, 0], sizes = [8, 16], strides = [1, 1]} : vector<8x32xf32> to vector<8x16xf32>
    %184 = vector.extract_strided_slice %182 {offsets = [0, 16], sizes = [8, 16], strides = [1, 1]} : vector<8x32xf32> to vector<8x16xf32>
    %185 = vector.extract_strided_slice %172 {offsets = [0, 32], sizes = [8, 16], strides = [1, 1]} : vector<8x48xf32> to vector<8x16xf32>
    %186 = vector.extract_strided_slice %174 {offsets = [0, 32], sizes = [8, 16], strides = [1, 1]} : vector<8x48xf32> to vector<8x16xf32>
    %187 = arith.mulf %183, %186 : vector<8x16xf32>
    %188 = arith.addf %185, %187 : vector<8x16xf32>
    %189 = math.tanh %188 : vector<8x16xf32>
    %cst_30 = arith.constant 1.000000e+00 : f32
    %190 = vector.broadcast %cst_30 : f32 to vector<8x16xf32>
    %191 = arith.subf %190, %184 : vector<8x16xf32>
    %192 = arith.mulf %191, %189 : vector<8x16xf32>
    %193 = arith.mulf %184, %171 : vector<8x16xf32>
    %194 = arith.addf %192, %193 : vector<8x16xf32>
    %c0_31 = arith.constant 0 : index
    %c0_32 = arith.constant 0 : index
    %195 = vector.load %arg2[%c0_31, %c0_32] : memref<17x8xf32, #tpu.memory_space<vmem>>, vector<16x8xf32>
    %c16_33 = arith.constant 16 : index
    %c0_34 = arith.constant 0 : index
    %196 = vector.load %arg2[%c16_33, %c0_34] : memref<17x8xf32, #tpu.memory_space<vmem>>, vector<1x8xf32>
    %c0_35 = arith.constant 0 : index
    %c0_36 = arith.constant 0 : index
    %197 = vector.load %arg3[%c0_35, %c0_36] : memref<9x4xf32, #tpu.memory_space<vmem>>, vector<8x4xf32>
    %c8 = arith.constant 8 : index
    %c0_37 = arith.constant 0 : index
    %198 = vector.load %arg3[%c8, %c0_37] : memref<9x4xf32, #tpu.memory_space<vmem>>, vector<1x4xf32>
    %cst_38 = arith.constant dense<0.000000e+00> : vector<8x8xf32>
    %199 = tpu.matmul %194, %195, %cst_38 {dimension_numbers = #tpu.dot_dimension_numbers<[1], [0], [0], [1], [0, 0, 1, 1], [], []>} : vector<8x16xf32>, vector<16x8xf32>, vector<8x8xf32> -> vector<8x8xf32>
    %200 = vector.broadcast %196 : vector<1x8xf32> to vector<8x8xf32>
    %201 = arith.addf %199, %200 : vector<8x8xf32>
    %cst_39 = arith.constant 0.000000e+00 : f32
    %202 = vector.broadcast %cst_39 : f32 to vector<8x8xf32>
    %203 = arith.maximumf %201, %202 : vector<8x8xf32>
    %cst_40 = arith.constant dense<0.000000e+00> : vector<8x4xf32>
    %204 = tpu.matmul %203, %197, %cst_40 {dimension_numbers = #tpu.dot_dimension_numbers<[1], [0], [0], [1], [0, 0, 1, 1], [], []>} : vector<8x8xf32>, vector<8x4xf32>, vector<8x4xf32> -> vector<8x4xf32>
    %205 = vector.broadcast %198 : vector<1x4xf32> to vector<8x4xf32>
    %206 = arith.addf %204, %205 : vector<8x4xf32>
    %c0_41 = arith.constant 0 : index
    %c0_42 = arith.constant 0 : index
    %207 = vector.load %arg4[%c0_41, %c0_42] : memref<8x4xf32, #tpu.memory_space<vmem>>, vector<8x4xf32>
    tpu.vector_store %arg4[%c0_41, %c0_42], %206 {strides = array<i32>} : memref<8x4xf32, #tpu.memory_space<vmem>>, vector<8x4xf32>,
    return
  }
}

</mosaic_0001>

<bundles_post_ra>
// kernel: tpu_custom_call.1
= control target key start
LH: loop header
LB: loop body
LE: loop exit
PB: predicated region body
PF: predicated region fallthrough
CT: control target
= control target key end

     0   :  { %vm59_vm0 = vcmask 1043456   ;;  %vm34_vm1 = vcmask 31744   ;;  %v1378_v0 = vmov 0.0|0.0   ;;  %vm1379_vm2 = vmmov 0   ;;  %s1381_s27 = smov 96   ;;  %s1382_s30 = smov 32   ;;  %s1582_s1 = inlined_call_operand.vmem [shape: f32[22,48], index: 1, kind: input, shape index: {}]   ;;  %s1583_s0 = inlined_call_operand.vmem [shape: f32[64,4], index: 0, kind: input, shape index: {}]   ;;  %s1584_s2 = inlined_call_operand.vmem [shape: f32[17,8], index: 2, kind: input, shape index: {}]   ;;  %s1585_s3 = inlined_call_operand.vmem [shape: f32[9,4], index: 3, kind: input, shape index: {}]   ;;  %s1586_s4 = inlined_call_operand.vmem [shape: f32[8,4], index: 4, kind: output, shape index: {}]  }
   0x1   :  { %1297 = vmatprep.subr.bf16.mxu1 %v1378_v0  ;;  %v17_v1 = vld [vmem:[%s1582_s1] sm:$0xff]  ;;  %v18_v2 = vld [vmem:[%s1582_s1 + $0x8] sm:$0xff]  ;;  %v19_v3 = vld [vmem:[%s1582_s1 + $0x10] sm:$0xf]  ;;  %v1380_v6 = vmov 0.0   ;;  %vm172_vm3 = vcmask 130048  }
   0x2   :  { %1215 = vmatprep.subr.msk.mxu0 %vm59_vm0, %v19_v3  ;;  %v1419_v4 = vpack.c.bf16 %v18_v2, %v17_v1  ;;  %v22_v5 = vld [vmem:[%s1583_s0] sm:$0xff]  ;;  %1233 = vmatprep.mubr.msk.f32.mxu1 %vm1379_vm2, %v1380_v6  ;;  %v23_v7 = vld [vmem:[%s1583_s0 + $0x8] sm:$0xff]  ;;  %v1444_v9 = vld [vmem:[%s1582_s1 + $0x14] ss:$0 sm:$0xff]  ;;  %vm1068_vm4 = vcmask 64512  }
   0x3   :  { %1216 = vmatpush3.msk.msra.mxu0 %vm59_vm0, %v19_v3  ;;  %1217 = vmatprep.mubr.msk.f32.mxu0 %vm34_vm1, %v22_v5  ;;  %v1451_v14 = vld [vmem:[%s1582_s1 + $0x15] ss:$0 sm:$0xff]  ;;  %s1383_s1 = smov 112   ;;  %v25_v46 = vld [vmem:[%s1583_s0 + $0x18] sm:$0xff] }
   0x4   :  { %1299 = vmatpush3.bf16.msra.mxu1 %v1419_v4  ;;  %1218 = vmatmul.mubr.msk.f32.vlgmr.msra.gmra.mrb[0].mxu0 %vm34_vm1, %v23_v7  ;;  %v24_v45 = vld [vmem:[%s1583_s0 + $0x10] sm:$0xff] }
   0x5   :  { %1300 = vmatprep.subr.bf16.mxu1 %v1378_v0  ;;  %1309 = vmatprep.subr.bf16.mxu0 %v1378_v0 }
   0x6   :  { %1311 = vmatpush3.bf16.msra.mxu0 %v1419_v4  ;;  %1220 = vmatprep.mubr.msk.f32.mxu0 %vm34_vm1, %v24_v45 }
   0x7   :  { %1234 = vmatmul.mubr.f32.vlgmr.msra.gmra.mrb[0].mxu1 %v1380_v6  ;;  %1315 = vmatprep.subr.bf16.mxu0 %v1378_v0 }
   0x8   :  { %1302 = vmatpush3.bf16.msra.mxu1 %v1419_v4  ;;  %1240 = vmatprep.mubr.msk.f32.mxu1 %vm1379_vm2, %v1380_v6 }
   0x9   :  { %1303 = vmatprep.subr.bf16.mxu1 %v1378_v0  ;;  %1221 = vmatmul.mubr.msk.f32.gmra.mrb[2].mxu0 %vm34_vm1, %v25_v46 }
  0xd7   :  { %v1219_v8 = vpop.f32.mrb[0].mxu0 }
  0xd8   :  { %v129_v10 = vpop.f32.mrb[1].mxu0  ;;  %v135_v35 = vadd.f32 %v1219_v8, %v1451_v14 }
  0xd9   :  { %v130_v15 = vadd.f32 %v1451_v14, %v129_v10 }
  0xda   :  { %v242_v11 = vpop.f32.mrb[0].mxu1 }
  0xdb   :  { %v243_v12 = vadd.f32 %v1444_v9, %v242_v11  ;;  %v1235_v13 = vpop.f32.mrb[1].mxu1 }
  0xdc   :  { %v1222_v53 = vpop.f32.mrb[2].mxu0 }
  0xdd   :  { %254 = vrot.lane.b32.xlu0 %v243_v12, %s1381_s27  ;;  %v246_v16 = vadd.f32 %v243_v12, %v130_v15  ;;  %v139_v54 = vpop.f32.mrb[3].mxu0 }
  0xde   :  { %v140_v59 = vadd.f32 %v1451_v14, %v139_v54 }
  0xdf   :  { %v1158_v17 = vmul.f32 -1.442695, %v246_v16 }
  0xe1   :  { %1330 = vpow2.f32 %v1158_v17 }
  0xeb   :  { %v1331_v18 = vpop.eup %1330 }
  0xec   :  { %v250_v19 = vadd.f32 1.0, %v1331_v18 }
  0xee   :  { %1332 = vrcp.f32 %v250_v19 }
  0xf8   :  { %v1333_v20 = vpop.eup %1332 }
  0xf9   :  { %v264_v26 = vsub.f32 1.0, %v1333_v20  ;;  %v270_v28 = vmul.f32 0.0, %v1333_v20 }
 0x14f   :  { %v255_v21 = vpop.permute.xlu0 %254 }
 0x150   :  { %v257_v22 = vmul.f32 %v1333_v20, %v255_v21  ;;  %v145_v20 = vadd.f32 %v1222_v53, %v1451_v14 }
 0x152   :  { %259 = vrot.lane.b32.xlu0 %v257_v22, %s1382_s30 }
 0x1c4   :  { %v260_v23 = vpop.permute.xlu0 %259 }
 0x1c5   :  { %v262_v24 = vadd.f32 %v260_v23, %v130_v15 }
 0x1c7   :  { %1334 = vtanh.f32 %v262_v24 }
 0x1d1   :  { %v1335_v25 = vpop.eup %1334 }
 0x1d2   :  { %266 = vrot.lane.b32.xlu1 %v1335_v25, %s1383_s1 }
 0x244   :  { %v267_v27 = vpop.permute.xlu1 %266 }
 0x245   :  { %v269_v29 = vmul.f32 %v267_v27, %v264_v26 }
 0x247   :  { %v271_v30 = vadd.f32 %v270_v28, %v269_v29 }
 0x249   :  { %273 = vrot.lane.b32.xlu1 %v271_v30, %s1383_s1 }
 0x2bb   :  { %v274_v31 = vpop.permute.xlu1 %273 }
 0x2bc   :  { %1241 = vmatmul.mubr.msk.f32.vlgmr.msra.gmra.mrb[2].mxu1 %vm172_vm3, %v274_v31  ;;  %v27_v31 = vld [vmem:[%s1583_s0 + $0x28] sm:$0xff] }
 0x2bd   :  { %1305 = vmatpush3.bf16.msra.mxu1 %v1419_v4  ;;  %1247 = vmatprep.mubr.msk.f32.mxu1 %vm1379_vm2, %v1380_v6 }
 0x2be   :  { %1306 = vmatprep.subr.bf16.mxu1 %v1378_v0 }
 0x38f   :  { %v343_v32 = vpop.f32.mrb[2].mxu1 }
 0x390   :  { %v344_v33 = vadd.f32 %v1444_v9, %v343_v32  ;;  %v1242_v34 = vpop.f32.mrb[3].mxu1  ;;  %v28_v32 = vld [vmem:[%s1583_s0 + $0x30] sm:$0xff] }
 0x392   :  { %355 = vrot.lane.b32.xlu0 %v344_v33, %s1381_s27  ;;  %v347_v36 = vadd.f32 %v344_v33, %v135_v35  ;;  %v29_v33 = vld [vmem:[%s1583_s0 + $0x38] sm:$0xff] }
 0x394   :  { %v1160_v37 = vmul.f32 -1.442695, %v347_v36 }
 0x396   :  { %1336 = vpow2.f32 %v1160_v37 }
 0x3a0   :  { %v1337_v38 = vpop.eup %1336 }
 0x3a1   :  { %v351_v39 = vadd.f32 1.0, %v1337_v38 }
 0x3a3   :  { %1338 = vrcp.f32 %v351_v39 }
 0x3ad   :  { %v1339_v40 = vpop.eup %1338 }
 0x3ae   :  { %v365_v48 = vsub.f32 1.0, %v1339_v40  ;;  %v371_v50 = vmul.f32 %v1339_v40, %v271_v30  ;;  %v26_v30 = vld [vmem:[%s1583_s0 + $0x20] sm:$0xff] }
 0x3af   :  { %1223 = vmatprep.mubr.msk.f32.mxu0 %vm34_vm1, %v26_v30 }
 0x3b0   :  { %1224 = vmatmul.mubr.msk.f32.gmra.mrb[4].mxu0 %vm34_vm1, %v27_v31 }
 0x3b1   :  { %1226 = vmatprep.mubr.msk.f32.mxu0 %vm34_vm1, %v28_v32 }
 0x3b4   :  { %1227 = vmatmul.mubr.msk.f32.gmra.mrb[6].mxu0 %vm34_vm1, %v29_v33 }
 0x3b5   :  { %1261 = vmatprep.mubr.msk.f32.mxu0 %vm1379_vm2, %v1380_v6 }
 0x404   :  { %v356_v41 = vpop.permute.xlu0 %355 }
 0x405   :  { %v358_v42 = vmul.f32 %v1339_v40, %v356_v41 }
 0x407   :  { %360 = vrot.lane.b32.xlu1 %v358_v42, %s1382_s30 }
 0x479   :  { %v361_v43 = vpop.permute.xlu1 %360 }
 0x47a   :  { %v363_v44 = vadd.f32 %v361_v43, %v135_v35 }
 0x47c   :  { %1340 = vtanh.f32 %v363_v44 }
 0x483   :  { %v1225_v40 = vpop.f32.mrb[4].mxu0 }
 0x484   :  { %v149_v41 = vpop.f32.mrb[5].mxu0 }
 0x486   :  { %v1341_v47 = vpop.eup %1340 }
 0x487   :  { %367 = vrot.lane.b32.xlu0 %v1341_v47, %s1383_s1  ;;  %v1516_v42 = vpop.f32.mrb[6].mxu0 }
 0x488   :  { %v1518_v43 = vpop.f32.mrb[7].mxu0 }
 0x4f9   :  { %v368_v49 = vpop.permute.xlu0 %367 }
 0x4fa   :  { %v370_v51 = vmul.f32 %v368_v49, %v365_v48  ;;  %v150_v48 = vadd.f32 %v1451_v14, %v149_v41 }
 0x4fc   :  { %v372_v52 = vadd.f32 %v371_v50, %v370_v51 }
 0x4fe   :  { %374 = vrot.lane.b32.xlu1 %v372_v52, %s1383_s1 }
 0x570   :  { %v375_v55 = vpop.permute.xlu1 %374 }
 0x571   :  { %1248 = vmatmul.mubr.msk.f32.vlgmr.msra.gmra.mrb[4].mxu1 %vm172_vm3, %v375_v55 }
 0x572   :  { %1308 = vmatpush3.bf16.msra.mxu1 %v1419_v4  ;;  %1254 = vmatprep.mubr.msk.f32.mxu1 %vm1379_vm2, %v1380_v6 }
 0x573   :  { %1312 = vmatprep.subr.bf16.mxu1 %v1378_v0 }
 0x644   :  { %v444_v56 = vpop.f32.mrb[4].mxu1 }
 0x645   :  { %v445_v57 = vadd.f32 %v1444_v9, %v444_v56  ;;  %v1249_v58 = vpop.f32.mrb[5].mxu1 }
 0x647   :  { %456 = vrot.lane.b32.xlu0 %v445_v57, %s1381_s27  ;;  %v448_v60 = vadd.f32 %v445_v57, %v140_v59 }
 0x649   :  { %v1162_v61 = vmul.f32 -1.442695, %v448_v60 }
 0x64b   :  { %1342 = vpow2.f32 %v1162_v61 }
 0x655   :  { %v1343_v62 = vpop.eup %1342 }
 0x656   :  { %v452_v63 = vadd.f32 1.0, %v1343_v62 }
 0x658   :  { %1344 = vrcp.f32 %v452_v63 }
 0x662   :  { %v1345_v1 = vpop.eup %1344 }
 0x663   :  { %v466_v10 = vsub.f32 1.0, %v1345_v1  ;;  %v472_v12 = vmul.f32 %v1345_v1, %v372_v52 }
 0x6b9   :  { %v457_v2 = vpop.permute.xlu0 %456 }
 0x6ba   :  { %v459_v3 = vmul.f32 %v1345_v1, %v457_v2 }
 0x6bc   :  { %461 = vrot.lane.b32.xlu1 %v459_v3, %s1382_s30 }
 0x72e   :  { %v462_v5 = vpop.permute.xlu1 %461 }
 0x72f   :  { %v464_v7 = vadd.f32 %v462_v5, %v140_v59  ;;  %v155_v5 = vadd.f32 %v1225_v40, %v1451_v14 }
 0x731   :  { %1346 = vtanh.f32 %v464_v7 }
 0x73b   :  { %v1347_v8 = vpop.eup %1346 }
 0x73c   :  { %468 = vrot.lane.b32.xlu0 %v1347_v8, %s1383_s1 }
 0x7ae   :  { %v469_v11 = vpop.permute.xlu0 %468 }
 0x7af   :  { %v471_v13 = vmul.f32 %v469_v11, %v466_v10 }
 0x7b1   :  { %v473_v15 = vadd.f32 %v472_v12, %v471_v13 }
 0x7b3   :  { %475 = vrot.lane.b32.xlu1 %v473_v15, %s1383_s1 }
 0x825   :  { %v476_v16 = vpop.permute.xlu1 %475 }
 0x826   :  { %1255 = vmatmul.mubr.msk.f32.vlgmr.msra.gmra.mrb[6].mxu1 %vm172_vm3, %v476_v16 }
 0x827   :  { %1314 = vmatpush3.bf16.msra.mxu1 %v1419_v4  ;;  %1268 = vmatprep.mubr.msk.f32.mxu1 %vm1379_vm2, %v1380_v6 }
 0x828   :  { %1318 = vmatprep.subr.bf16.mxu1 %v1378_v0 }
 0x8f9   :  { %v545_v17 = vpop.f32.mrb[6].mxu1 }
 0x8fa   :  { %v546_v18 = vadd.f32 %v1444_v9, %v545_v17  ;;  %v1256_v19 = vpop.f32.mrb[7].mxu1 }
 0x8fc   :  { %557 = vrot.lane.b32.xlu0 %v546_v18, %s1381_s27  ;;  %v549_v21 = vadd.f32 %v546_v18, %v145_v20 }
 0x8fe   :  { %v1164_v22 = vmul.f32 -1.442695, %v549_v21 }
 0x900   :  { %1348 = vpow2.f32 %v1164_v22 }
 0x90a   :  { %v1349_v23 = vpop.eup %1348 }
 0x90b   :  { %v553_v24 = vadd.f32 1.0, %v1349_v23 }
 0x90d   :  { %1350 = vrcp.f32 %v553_v24 }
 0x917   :  { %v1351_v25 = vpop.eup %1350 }
 0x918   :  { %v567_v35 = vsub.f32 1.0, %v1351_v25  ;;  %v573_v37 = vmul.f32 %v1351_v25, %v473_v15 }
 0x96e   :  { %v558_v26 = vpop.permute.xlu0 %557 }
 0x96f   :  { %v560_v27 = vmul.f32 %v1351_v25, %v558_v26 }
 0x971   :  { %562 = vrot.lane.b32.xlu1 %v560_v27, %s1382_s30  ;;  %v160_v27 = vadd.f32 %v1451_v14, %v1518_v43 }
 0x9e3   :  { %v563_v28 = vpop.permute.xlu1 %562 }
 0x9e4   :  { %v565_v29 = vadd.f32 %v563_v28, %v145_v20 }
 0x9e6   :  { %1352 = vtanh.f32 %v565_v29 }
 0x9f0   :  { %v1353_v34 = vpop.eup %1352 }
 0x9f1   :  { %569 = vrot.lane.b32.xlu0 %v1353_v34, %s1383_s1 }
 0xa63   :  { %v570_v36 = vpop.permute.xlu0 %569 }
 0xa64   :  { %v572_v38 = vmul.f32 %v570_v36, %v567_v35 }
 0xa66   :  { %v574_v39 = vadd.f32 %v573_v37, %v572_v38 }
 0xa68   :  { %576 = vrot.lane.b32.xlu1 %v574_v39, %s1383_s1 }
 0xada   :  { %v577_v44 = vpop.permute.xlu1 %576 }
 0xadb   :  { %1262 = vmatmul.mubr.msk.f32.vlgmr.msra.gmra.mrb[8].mxu0 %vm172_vm3, %v577_v44 }
 0xadc   :  { %1317 = vmatpush3.bf16.msra.mxu0 %v1419_v4  ;;  %1275 = vmatprep.mubr.msk.f32.mxu0 %vm1379_vm2, %v1380_v6 }
 0xadd   :  { %1321 = vmatprep.subr.bf16.mxu0 %v1378_v0 }
 0xbae   :  { %v646_v45 = vpop.f32.mrb[8].mxu0 }
 0xbaf   :  { %v647_v46 = vadd.f32 %v1444_v9, %v646_v45  ;;  %v1263_v47 = vpop.f32.mrb[9].mxu0 }
 0xbb1   :  { %658 = vrot.lane.b32.xlu0 %v647_v46, %s1381_s27  ;;  %v650_v49 = vadd.f32 %v647_v46, %v150_v48 }
 0xbb3   :  { %v1166_v50 = vmul.f32 -1.442695, %v650_v49 }
 0xbb5   :  { %1354 = vpow2.f32 %v1166_v50 }
 0xbbf   :  { %v1355_v51 = vpop.eup %1354 }
 0xbc0   :  { %v654_v52 = vadd.f32 1.0, %v1355_v51 }
 0xbc2   :  { %1356 = vrcp.f32 %v654_v52 }
 0xbcc   :  { %v1357_v53 = vpop.eup %1356 }
 0xbcd   :  { %v668_v58 = vsub.f32 1.0, %v1357_v53  ;;  %v674_v60 = vmul.f32 %v1357_v53, %v574_v39 }
 0xc23   :  { %v659_v54 = vpop.permute.xlu0 %658 }
 0xc24   :  { %v661_v55 = vmul.f32 %v1357_v53, %v659_v54 }
 0xc26   :  { %663 = vrot.lane.b32.xlu1 %v661_v55, %s1382_s30 }
 0xc98   :  { %v664_v0 = vpop.permute.xlu1 %663 }
 0xc99   :  { %v666_v56 = vadd.f32 %v664_v0, %v150_v48  ;;  %v165_v48 = vadd.f32 %v1516_v42, %v1451_v14  ;;  %v980_v14 = vld [vmem:[%s1584_s2 + $0x8] sm:$0xff] }
 0xc9b   :  { %1358 = vtanh.f32 %v666_v56 }
 0xca5   :  { %v1359_v57 = vpop.eup %1358 }
 0xca6   :  { %670 = vrot.lane.b32.xlu0 %v1359_v57, %s1383_s1 }
 0xd18   :  { %v671_v59 = vpop.permute.xlu0 %670 }
 0xd19   :  { %v673_v61 = vmul.f32 %v671_v59, %v668_v58 }
 0xd1b   :  { %v675_v62 = vadd.f32 %v674_v60, %v673_v61 }
 0xd1d   :  { %677 = vrot.lane.b32.xlu1 %v675_v62, %s1383_s1 }
 0xd8f   :  { %v678_v63 = vpop.permute.xlu1 %677 }
 0xd90   :  { %1269 = vmatmul.mubr.msk.f32.vlgmr.msra.gmra.mrb[8].mxu1 %vm172_vm3, %v678_v63  ;;  %v982_v63 = vld [vmem:[%s1585_s3] sm:$0xff] }
 0xd91   :  { %1320 = vmatpush3.bf16.msra.mxu1 %v1419_v4  ;;  %1282 = vmatprep.mubr.msk.f32.mxu1 %vm1379_vm2, %v1380_v6 }
 0xd92   :  { %1292 = vmatprep.subr.mxu1 %v1380_v6 }
 0xe63   :  { %v747_v1 = vpop.f32.mrb[8].mxu1 }
 0xe64   :  { %v748_v2 = vadd.f32 %v1444_v9, %v747_v1  ;;  %v1270_v3 = vpop.f32.mrb[9].mxu1  ;;  %v1173_v1 = vld [vmem:[%s1584_s2 + $0x10] ss:$0 sm:$0xff] }
 0xe66   :  { %759 = vrot.lane.b32.xlu0 %v748_v2, %s1381_s27  ;;  %v751_v7 = vadd.f32 %v748_v2, %v155_v5 }
 0xe68   :  { %v1168_v8 = vmul.f32 -1.442695, %v751_v7 }
 0xe6a   :  { %1360 = vpow2.f32 %v1168_v8  ;;  %v1175_v8 = vld [vmem:[%s1585_s3 + $0x8] ss:$0 sm:$0xff] }
 0xe74   :  { %v1361_v10 = vpop.eup %1360 }
 0xe75   :  { %v755_v11 = vadd.f32 1.0, %v1361_v10 }
 0xe77   :  { %1362 = vrcp.f32 %v755_v11 }
 0xe81   :  { %v1363_v4 = vpop.eup %1362 }
 0xe82   :  { %v769_v18 = vsub.f32 1.0, %v1363_v4  ;;  %v775_v20 = vmul.f32 %v1363_v4, %v675_v62 }
 0xed8   :  { %v760_v12 = vpop.permute.xlu0 %759 }
 0xed9   :  { %v762_v13 = vmul.f32 %v1363_v4, %v760_v12 }
 0xedb   :  { %764 = vrot.lane.b32.xlu1 %v762_v13, %s1382_s30 }
 0xf4d   :  { %v765_v15 = vpop.permute.xlu1 %764 }
 0xf4e   :  { %v767_v16 = vadd.f32 %v765_v15, %v155_v5 }
 0xf50   :  { %1364 = vtanh.f32 %v767_v16 }
 0xf5a   :  { %v1365_v17 = vpop.eup %1364 }
 0xf5b   :  { %771 = vrot.lane.b32.xlu0 %v1365_v17, %s1383_s1 }
 0xfcd   :  { %v772_v19 = vpop.permute.xlu0 %771 }
 0xfce   :  { %v774_v21 = vmul.f32 %v772_v19, %v769_v18 }
 0xfd0   :  { %v776_v22 = vadd.f32 %v775_v20, %v774_v21 }
 0xfd2   :  { %778 = vrot.lane.b32.xlu1 %v776_v22, %s1383_s1 }
0x1044   :  { %v779_v23 = vpop.permute.xlu1 %778 }
0x1045   :  { %1276 = vmatmul.mubr.msk.f32.vlgmr.msra.gmra.mrb[10].mxu0 %vm172_vm3, %v779_v23 }
0x1046   :  { %1289 = vmatprep.mubr.msk.f32.mxu0 %vm1379_vm2, %v1380_v6 }
0x1118   :  { %v848_v24 = vpop.f32.mrb[10].mxu0 }
0x1119   :  { %v849_v25 = vadd.f32 %v1444_v9, %v848_v24  ;;  %v1277_v26 = vpop.f32.mrb[11].mxu0 }
0x111b   :  { %860 = vrot.lane.b32.xlu0 %v849_v25, %s1381_s27  ;;  %v852_v28 = vadd.f32 %v849_v25, %v160_v27 }
0x111d   :  { %v1170_v29 = vmul.f32 -1.442695, %v852_v28 }
0x111f   :  { %1366 = vpow2.f32 %v1170_v29 }
0x1129   :  { %v1367_v30 = vpop.eup %1366 }
0x112a   :  { %v856_v31 = vadd.f32 1.0, %v1367_v30 }
0x112c   :  { %1368 = vrcp.f32 %v856_v31 }
0x1136   :  { %v1369_v32 = vpop.eup %1368 }
0x1137   :  { %v870_v38 = vsub.f32 1.0, %v1369_v32  ;;  %v876_v40 = vmul.f32 %v1369_v32, %v776_v22 }
0x118d   :  { %v861_v33 = vpop.permute.xlu0 %860 }
0x118e   :  { %v863_v34 = vmul.f32 %v1369_v32, %v861_v33 }
0x1190   :  { %865 = vrot.lane.b32.xlu1 %v863_v34, %s1382_s30 }
0x1202   :  { %v866_v35 = vpop.permute.xlu1 %865 }
0x1203   :  { %v868_v36 = vadd.f32 %v866_v35, %v160_v27 }
0x1205   :  { %1370 = vtanh.f32 %v868_v36 }
0x120f   :  { %v1371_v37 = vpop.eup %1370 }
0x1210   :  { %872 = vrot.lane.b32.xlu0 %v1371_v37, %s1383_s1 }
0x1282   :  { %v873_v39 = vpop.permute.xlu0 %872 }
0x1283   :  { %v875_v41 = vmul.f32 %v873_v39, %v870_v38 }
0x1285   :  { %v877_v43 = vadd.f32 %v876_v40, %v875_v41 }
0x1287   :  { %879 = vrot.lane.b32.xlu1 %v877_v43, %s1383_s1 }
0x12f9   :  { %v880_v44 = vpop.permute.xlu1 %879 }
0x12fa   :  { %1283 = vmatmul.mubr.msk.f32.vlgmr.msra.gmra.mrb[10].mxu1 %vm172_vm3, %v880_v44 }
0x12fb   :  { %1294 = vmatprep.mubr.msk.f32.mxu1 %vm1379_vm2, %v1380_v6  ;;  %1293 = vmatpush3.msra.mxu1 %v982_v63 }
0x13cd   :  { %v949_v45 = vpop.f32.mrb[10].mxu1 }
0x13ce   :  { %v950_v46 = vadd.f32 %v1444_v9, %v949_v45  ;;  %v1284_v47 = vpop.f32.mrb[11].mxu1  ;;  %v979_v9 = vld [vmem:[%s1584_s2] sm:$0xff] }
0x13cf   :  { %v1322_v42 = vpack.c.bf16 %v980_v14, %v979_v9 }
0x13d0   :  { %961 = vrot.lane.b32.xlu0 %v950_v46, %s1381_s27  ;;  %v953_v49 = vadd.f32 %v950_v46, %v165_v48 }
0x13d1   :  { %1323 = vmatpush3.bf16.msra.mxu0 %v1322_v42 }
0x13d2   :  { %v1172_v50 = vmul.f32 -1.442695, %v953_v49 }
0x13d4   :  { %1372 = vpow2.f32 %v1172_v50 }
0x13de   :  { %v1373_v51 = vpop.eup %1372 }
0x13df   :  { %v957_v52 = vadd.f32 1.0, %v1373_v51 }
0x13e1   :  { %1374 = vrcp.f32 %v957_v52 }
0x13eb   :  { %v1375_v53 = vpop.eup %1374 }
0x13ec   :  { %v971_v57 = vsub.f32 1.0, %v1375_v53  ;;  %v977_v59 = vmul.f32 %v1375_v53, %v877_v43 }
0x1442   :  { %v962_v54 = vpop.permute.xlu0 %961 }
0x1443   :  { %v964_v55 = vmul.f32 %v1375_v53, %v962_v54 }
0x1445   :  { %966 = vrot.lane.b32.xlu1 %v964_v55, %s1382_s30 }
0x14b7   :  { %v967_v6 = vpop.permute.xlu1 %966 }
0x14b8   :  { %v969_v0 = vadd.f32 %v967_v6, %v165_v48 }
0x14ba   :  { %1376 = vtanh.f32 %v969_v0 }
0x14c4   :  { %v1377_v56 = vpop.eup %1376 }
0x14c5   :  { %973 = vrot.lane.b32.xlu0 %v1377_v56, %s1383_s1 }
0x1537   :  { %v974_v58 = vpop.permute.xlu0 %973 }
0x1538   :  { %v976_v60 = vmul.f32 %v974_v58, %v971_v57 }
0x153a   :  { %v978_v61 = vadd.f32 %v977_v59, %v976_v60 }
0x153c   :  { %989 = vrot.lane.b32.xlu1 %v978_v61, %s1383_s1 }
0x15ae   :  { %v990_v62 = vpop.permute.xlu1 %989 }
0x15af   :  { %1290 = vmatmul.mubr.msk.f32.vlgmr.msra.gmra.mrb[12].mxu0 %vm172_vm3, %v990_v62 }
0x1682   :  { %v1059_v2 = vpop.f32.mrb[12].mxu0 }
0x1683   :  { %v1060_v3 = vadd.f32 %v1173_v1, %v1059_v2  ;;  %v1291_v5 = vpop.f32.mrb[13].mxu0 }
0x1685   :  { %v1063_v7 = vmax.f32 %v1060_v3, 0.0 }
0x1687   :  { %1295 = vmatmul.mubr.msk.f32.vlgmr.msra.gmra.mrb[12].mxu1 %vm1068_vm4, %v1063_v7 }
0x175a   :  { %v1138_v10 = vpop.f32.mrb[12].mxu1 }
0x175b   :  { %v1139_v11 = vadd.f32 %v1175_v8, %v1138_v10  ;;  %v1296_v4 = vpop.f32.mrb[13].mxu1 }
0x175d   :  { %1142 = vst.msk [vmem:[%s1586_s4] sm:$0xff] %vm34_vm1, %v1139_v11 }

</bundles_post_ra>
